<compile_context>
chip_gen: v5e
topology: v5e:2x2
jax: 0.10.0
libtpu: 0.0.40
codegen_flags: <defaults>
</compile_context>

<pallas_src>
import functools

import jax
import jax.numpy as jnp
from jax.experimental import pallas as pl
from jax.experimental.pallas import tpu as pltpu

_NEG_BIG = -1e30  # safe "-inf" for masking (keeps exp()/max() finite)


def _nt_xent_lse_kernel(zq_ref, zk_ref, out_ref, m_sc, l_sc, *,
                        block, k_resident):
    """One (T, T) tile of the similarity matrix with online logsumexp.

    zq_ref : (T, D)  q rows of z, pre-normalized and pre-scaled by 1/temperature
    zk_ref : (T, D) or (N, D) k rows of z, pre-normalized (full if k_resident)
    out_ref: (T, 1)  per-row logsumexp_{j != i} sim[i, j], written on last step
    m_sc   : (T, 1)  f32 running row max
    l_sc   : (T, 1)  f32 running row sum of exp
    """
    qi = pl.program_id(0)
    ki = pl.program_id(1)
    nk = pl.num_programs(1)

    @pl.when(ki == 0)
    def _init():
        m_sc[...] = jnp.full_like(m_sc, _NEG_BIG)
        l_sc[...] = jnp.zeros_like(l_sc)

    zq = zq_ref[...]

    # ---- k tile: either a streamed (T, D) block or a slice of resident z ----
    if k_resident:
        off = pl.multiple_of(ki * block, block)
        zk = zk_ref[pl.ds(off, block), :]
    else:
        zk = zk_ref[...]

    # sim tile = cos / temperature; contract last dims (trans_b form on the
    # MXU, z.T never materialized).  Operands arrive pre-normalized/pre-cast,
    # so the only per-step work here is the matmul itself.
    s = jax.lax.dot_general(zq, zk, (((1,), (1,)), ((), ())),
                            preferred_element_type=jnp.float32)

    # ---- exclude the diagonal of the full N x N matrix ------------------------
    # Global row = qi*T + r, global col = ki*T + c.  The select is a runtime
    # no-op on off-diagonal tiles (condition all-False) and avoids any scratch
    # round-trip through VMEM.
    r = jax.lax.broadcasted_iota(jnp.int32, s.shape, 0)
    c = jax.lax.broadcasted_iota(jnp.int32, s.shape, 1)
    s = jnp.where(r + (qi - ki) * block == c, jnp.float32(_NEG_BIG), s)

    # ---- online (streaming) logsumexp over the k axis -------------------------
    m_prev = m_sc[...]
    m_new = jnp.maximum(m_prev, jnp.max(s, axis=-1, keepdims=True))
    alpha = jnp.exp(m_prev - m_new)
    l_sc[...] = alpha * l_sc[...] + jnp.sum(jnp.exp(s - m_new),
                                            axis=-1, keepdims=True)
    m_sc[...] = m_new

    @pl.when(ki == nk - 1)
    def _finalize():
        out_ref[...] = m_sc[...] + jnp.log(l_sc[...])


def _vmem_capacity_bytes():
    try:
        return int(pltpu.get_tpu_info().vmem_capacity_bytes)
    except Exception:
        return 64 << 20  # conservative fallback (v7x per-TensorCore VMEM)


def _pick_block(n, d, itemsize, vmem_cap, requested=None):
    """Largest tile T (multiple of 8, dividing N) whose working set fits."""
    if requested is not None:
        t = int(requested)
        assert n % t == 0 and (t % 8 == 0 or t == n), "invalid block_size"
        return t
    legal = [t for t in (512, 256, 128, 64, 32, 16, 8)
             if t <= n and n % t == 0 and t % 8 == 0]
    if not legal:
        return n  # tiny / odd N: single full-array block (always legal)
    budget = vmem_cap // 4  # headroom for resident K + Mosaic internal scratch
    for t in legal:
        # q double-buffer + streamed-K double-buffer + (T, T) f32 intermediate
        if 4 * t * d * itemsize + 4 * t * t <= budget:
            return t
    return legal[-1]


def nt_xent_loss(z_i, z_j, *, batch_size, temperature, world_size=1,
                 block_size=None, use_bf16_matmul=True, k_buffer_count=None):
    # TODO(synk): world_size > 1 needs a cross-device all-gather (GatherLayer);
    # this single-device kernel treats it as the identity.
    assert world_size == 1, "single-device kernel (GatherLayer is identity)"
    assert z_i.shape == z_j.shape and z_i.ndim == 2
    half_n = batch_size * world_size
    n = 2 * half_n
    d = z_i.shape[1]
    assert z_i.shape[0] == half_n

    eps = 1e-8
    inv_temp = jnp.float32(1.0 / temperature)

    # torch.cat((z_i, z_j), 0), L2-normalized ONCE (fused O(N*D) XLA pass).
    z = jnp.concatenate([z_i, z_j], axis=0).astype(jnp.float32)        # (N, D)
    zn = z * jax.lax.rsqrt(
        jnp.maximum(jnp.sum(z * z, axis=-1, keepdims=True), eps * eps))

    # positive(i) = sim[i, (i + half_n) mod N]: cheap O(N*D) pass kept OUT of
    # the N x N kernel (f32; ~1e-3 inconsistency vs the bf16 matmul is fine
    # for a loss and is documented/tested below).
    zp = jnp.concatenate([zn[half_n:], zn[:half_n]], axis=0)
    pos = jnp.sum(zn * zp, axis=-1) * inv_temp                          # (N,)

    op_dtype = jnp.bfloat16 if use_bf16_matmul else jnp.float32
    itemsize = 2 if use_bf16_matmul else 4
    zq = (zn * inv_temp).astype(op_dtype)    # q operand carries 1/temperature
    zk = zn.astype(op_dtype)

    vmem_cap = _vmem_capacity_bytes()
    t = _pick_block(n, d, itemsize, vmem_cap, block_size)
    nq = n // t
    nk = n // t

    # Keep the whole K operand resident in VMEM (DMA'd once) when it fits the
    # generation's budget; count 2 revolving buffers since the constant-index
    # BlockSpec may still be double-buffered by the pipeline.
    k_resident = (2 * n * d * itemsize) <= (vmem_cap // 4) and nk > 1
    if k_resident:
        k_spec = pl.BlockSpec((n, d), lambda qi, ki: (0, 0))
    elif k_buffer_count is not None:
        # Optional deeper pipelining for the streamed-K path (sweepable).
        k_spec = pl.BlockSpec((t, d), lambda qi, ki: (ki, 0),
                              pipeline_mode=pl.Buffered(int(k_buffer_count)))
    else:
        k_spec = pl.BlockSpec((t, d), lambda qi, ki: (ki, 0))

    kernel = functools.partial(_nt_xent_lse_kernel,
                               block=t, k_resident=k_resident)

    # VMEM budget: q (double-buffered) + K operand (+revolving buffers) +
    # out + m/l scratch, plus headroom for the (T, T) f32 matmul intermediate.
    k_bytes = 2 * n * d * itemsize if k_resident else \
        (k_buffer_count or 2) * t * d * itemsize
    est = 2 * t * d * itemsize + k_bytes + 4 * t * t + 16 * t
    vmem_limit = int(min(max(2 * est, 16 << 20), (3 * vmem_cap) // 4))

    lse = pl.pallas_call(
        kernel,
        out_shape=jax.ShapeDtypeStruct((n, 1), jnp.float32),
        grid_spec=pltpu.PrefetchScalarGridSpec(
            num_scalar_prefetch=0,
            grid=(nq, nk),
            in_specs=[
                pl.BlockSpec((t, d), lambda qi, ki: (qi, 0)),   # q rows
                k_spec,                                         # k rows
            ],
            out_specs=pl.BlockSpec((t, 1), lambda qi, ki: (qi, 0)),
            scratch_shapes=[
                pltpu.VMEM((t, 1), jnp.float32),   # running max
                pltpu.VMEM((t, 1), jnp.float32),   # running sum of exp
            ]),
        compiler_params=pltpu.CompilerParams(
            # TODO(synk): on v7x, verify "parallel" shards the q axis across
            # both TensorCores; otherwise switch axis 0 to pltpu.CORE_PARALLEL.
            dimension_semantics=("parallel", "arbitrary"),
            vmem_limit_bytes=vmem_limit),
    )(zq, zk)

    return jnp.sum(lse[:, 0] - pos) / jnp.float32(n)


def nt_xent_reference(z_i, z_j, *, batch_size, temperature):
    """Pure-JAX reference mirroring the PyTorch forward, for validation."""
    half_n = batch_size
    n = 2 * half_n
    z = jnp.concatenate([z_i, z_j], axis=0).astype(jnp.float32)
    norm = jnp.sqrt(jnp.sum(z * z, axis=-1, keepdims=True))
    sim = (z @ z.T) / jnp.maximum(norm * norm.T, 1e-8) / temperature
    idx = jnp.arange(n)
    pos = sim[idx, (idx + half_n) % n]
    sim_nd = jnp.where(jnp.eye(n, dtype=bool), -jnp.inf, sim)
    lse = jax.scipy.special.logsumexp(sim_nd, axis=-1)
    return jnp.sum(lse - pos) / n


if __name__ == "__main__":
    batch_size = 16
    dim = 32
    temperature = 0.5

    key = jax.random.PRNGKey(0)
    k1, k2 = jax.random.split(key)
    z_i = jax.random.normal(k1, (batch_size, dim), dtype=jnp.float32)
    z_j = jax.random.normal(k2, (batch_size, dim), dtype=jnp.float32)

    ref = nt_xent_reference(z_i, z_j, batch_size=batch_size,
                            temperature=temperature)

    # f32 path with a forced 4x4 grid: exercises the online logsumexp, the
    # diagonal-tile masking and the resident-K pl.ds slicing; exact tolerance.
    loss_f32 = nt_xent_loss(z_i, z_j, batch_size=batch_size,
                            temperature=temperature, world_size=1,
                            block_size=8, use_bf16_matmul=False)
    loss_f32 = jax.block_until_ready(loss_f32)
    assert jnp.allclose(loss_f32, ref, rtol=1e-4, atol=1e-4), (loss_f32, ref)

    # Default fast path (bf16 MXU operands), single tile at this size.
    loss_bf16 = nt_xent_loss(z_i, z_j, batch_size=batch_size,
                             temperature=temperature, world_size=1)
    loss_bf16 = jax.block_until_ready(loss_bf16)
    assert jnp.allclose(loss_bf16, ref, rtol=3e-2, atol=3e-2), (loss_bf16, ref)

    # bf16 MXU with a 2x2 grid (16-row tiles keep bf16 sublane packing aligned).
    loss_bf16_tiled = nt_xent_loss(z_i, z_j, batch_size=batch_size,
                                   temperature=temperature, world_size=1,
                                   block_size=16)
    loss_bf16_tiled = jax.block_until_ready(loss_bf16_tiled)
    assert jnp.allclose(loss_bf16_tiled, ref, rtol=3e-2, atol=3e-2), (
        loss_bf16_tiled, ref)

    print("KERNEL_OK")
</pallas_src>

<mosaic_0001>
module attributes {stable_mosaic.version = 11 : i64} {
  func.func @_nt_xent_lse_kernel(%arg0: i32, %arg1: i32, %arg2: memref<8x32xf32, #tpu.memory_space<vmem>>, %arg3: memref<32x32xf32, #tpu.memory_space<vmem>>, %arg4: memref<8x1xf32, #tpu.memory_space<vmem>>, %arg5: memref<8x1xf32, #tpu.memory_space<vmem>>, %arg6: memref<8x1xf32, #tpu.memory_space<vmem>>) attributes {dimension_semantics = [#tpu.dimension_semantics<parallel>, #tpu.dimension_semantics<arbitrary>], iteration_bounds = array<i64: 4, 4>, scalar_prefetch = 0 : i64, scratch_operands = 2 : i64, tpu.core_type = #tpu.core_type<tc>, window_params = [{transform_indices = @transform_0, window_bounds = array<i64: 8, 32>}, {pipeline_mode = #tpu.pipeline_mode<synchronous>, transform_indices = @transform_1, window_bounds = array<i64: 32, 32>}, {transform_indices = @transform_2, window_bounds = array<i64: 8, 1>}]} {
    %c0_i32 = arith.constant 0 : i32
    %0 = arith.cmpi eq, %arg1, %c0_i32 : i32
    %1 = arith.extui %0 : i1 to i32
    %c0_i32_0 = arith.constant 0 : i32
    %2 = arith.cmpi ne, %1, %c0_i32_0 : i32
    scf.if %2 {
      %cst_16 = arith.constant -1.000000e+30 : f32
      %37 = vector.broadcast %cst_16 : f32 to vector<8x1xf32>
      %c0_17 = arith.constant 0 : index
      %c0_18 = arith.constant 0 : index
      %38 = vector.load %arg5[%c0_17, %c0_18] : memref<8x1xf32, #tpu.memory_space<vmem>>, vector<8x1xf32>
      tpu.vector_store %arg5[%c0_17, %c0_18], %37 {strides = array<i32>} : memref<8x1xf32, #tpu.memory_space<vmem>>, vector<8x1xf32>,
      %cst_19 = arith.constant 0.000000e+00 : f32
      %39 = vector.broadcast %cst_19 : f32 to vector<8x1xf32>
      %c0_20 = arith.constant 0 : index
      %c0_21 = arith.constant 0 : index
      %40 = vector.load %arg6[%c0_20, %c0_21] : memref<8x1xf32, #tpu.memory_space<vmem>>, vector<8x1xf32>
      tpu.vector_store %arg6[%c0_20, %c0_21], %39 {strides = array<i32>} : memref<8x1xf32, #tpu.memory_space<vmem>>, vector<8x1xf32>,
    } else {
    }
    %c0 = arith.constant 0 : index
    %c0_1 = arith.constant 0 : index
    %3 = vector.load %arg2[%c0, %c0_1] : memref<8x32xf32, #tpu.memory_space<vmem>>, vector<8x32xf32>
    %c8_i32 = arith.constant 8 : i32
    %4 = arith.muli %arg1, %c8_i32 : i32
    %5 = tpu.assume_multiple %4, 8 : i32
    %6 = arith.index_cast %5 : i32 to index
    %c0_2 = arith.constant 0 : index
    %7 = vector.load %arg3[%6, %c0_2] : memref<32x32xf32, #tpu.memory_space<vmem>>, vector<8x32xf32>
    %cst = arith.constant dense<0.000000e+00> : vector<8x8xf32>
    %8 = tpu.matmul %3, %7, %cst {dimension_numbers = #tpu.dot_dimension_numbers<[1], [1], [0], [0], [0, 0, 1, 0], [], []>} : vector<8x32xf32>, vector<8x32xf32>, vector<8x8xf32> -> vector<8x8xf32>
    %9 = tpu.iota {dimensions = array<i32: 0>} : vector<8x8xi32>
    %10 = tpu.iota {dimensions = array<i32: 1>} : vector<8x8xi32>
    %11 = arith.subi %arg0, %arg1 : i32
    %c8_i32_3 = arith.constant 8 : i32
    %12 = arith.muli %11, %c8_i32_3 : i32
    %13 = vector.broadcast %12 : i32 to vector<8x8xi32>
    %14 = arith.addi %9, %13 : vector<8x8xi32>
    %15 = arith.cmpi eq, %14, %10 : vector<8x8xi32>
    %cst_4 = arith.constant -1.000000e+30 : f32
    %16 = vector.broadcast %cst_4 : f32 to vector<8x8xf32>
    %17 = arith.select %15, %16, %8 : vector<8x8xi1>, vector<8x8xf32>
    %c0_5 = arith.constant 0 : index
    %c0_6 = arith.constant 0 : index
    %18 = vector.load %arg5[%c0_5, %c0_6] : memref<8x1xf32, #tpu.memory_space<vmem>>, vector<8x1xf32>
    %cst_7 = arith.constant dense<0xFF800000> : vector<8xf32>
    %19 = vector.multi_reduction <maximumf>, %17, %cst_7 [1] : vector<8x8xf32> to vector<8xf32>
    %20 = vector.shape_cast %19 : vector<8xf32> to vector<8x1xf32>
    %21 = arith.maximumf %18, %20 : vector<8x1xf32>
    %22 = arith.subf %18, %21 : vector<8x1xf32>
    %23 = math.exp %22 : vector<8x1xf32>
    %c0_8 = arith.constant 0 : index
    %c0_9 = arith.constant 0 : index
    %24 = vector.load %arg6[%c0_8, %c0_9] : memref<8x1xf32, #tpu.memory_space<vmem>>, vector<8x1xf32>
    %25 = arith.mulf %23, %24 : vector<8x1xf32>
    %26 = vector.broadcast %21 : vector<8x1xf32> to vector<8x8xf32>
    %27 = arith.subf %17, %26 : vector<8x8xf32>
    %28 = math.exp %27 : vector<8x8xf32>
    %cst_10 = arith.constant dense<0.000000e+00> : vector<8xf32>
    %29 = vector.multi_reduction <add>, %28, %cst_10 [1] : vector<8x8xf32> to vector<8xf32>
    %30 = vector.shape_cast %29 : vector<8xf32> to vector<8x1xf32>
    %31 = arith.addf %25, %30 : vector<8x1xf32>
    %c0_11 = arith.constant 0 : index
    %c0_12 = arith.constant 0 : index
    %32 = vector.load %arg6[%c0_11, %c0_12] : memref<8x1xf32, #tpu.memory_space<vmem>>, vector<8x1xf32>
    tpu.vector_store %arg6[%c0_11, %c0_12], %31 {strides = array<i32>} : memref<8x1xf32, #tpu.memory_space<vmem>>, vector<8x1xf32>,
    %c0_13 = arith.constant 0 : index
    %c0_14 = arith.constant 0 : index
    %33 = vector.load %arg5[%c0_13, %c0_14] : memref<8x1xf32, #tpu.memory_space<vmem>>, vector<8x1xf32>
    tpu.vector_store %arg5[%c0_13, %c0_14], %21 {strides = array<i32>} : memref<8x1xf32, #tpu.memory_space<vmem>>, vector<8x1xf32>,
    %c3_i32 = arith.constant 3 : i32
    %34 = arith.cmpi eq, %arg1, %c3_i32 : i32
    %35 = arith.extui %34 : i1 to i32
    %c0_i32_15 = arith.constant 0 : i32
    %36 = arith.cmpi ne, %35, %c0_i32_15 : i32
    scf.if %36 {
      %c0_16 = arith.constant 0 : index
      %c0_17 = arith.constant 0 : index
      %37 = vector.load %arg5[%c0_16, %c0_17] : memref<8x1xf32, #tpu.memory_space<vmem>>, vector<8x1xf32>
      %c0_18 = arith.constant 0 : index
      %c0_19 = arith.constant 0 : index
      %38 = vector.load %arg6[%c0_18, %c0_19] : memref<8x1xf32, #tpu.memory_space<vmem>>, vector<8x1xf32>
      %39 = math.log %38 : vector<8x1xf32>
      %40 = arith.addf %37, %39 : vector<8x1xf32>
      %c0_20 = arith.constant 0 : index
      %c0_21 = arith.constant 0 : index
      %41 = vector.load %arg4[%c0_20, %c0_21] : memref<8x1xf32, #tpu.memory_space<vmem>>, vector<8x1xf32>
      tpu.vector_store %arg4[%c0_20, %c0_21], %40 {strides = array<i32>} : memref<8x1xf32, #tpu.memory_space<vmem>>, vector<8x1xf32>,
    } else {
    }
    return
  }
  func.func @transform_0(%arg0: i32, %arg1: i32) -> (i32, i32) {
    %c0_i32 = arith.constant 0 : i32
    %c0_i32_0 = arith.constant 0 : i32
    return %arg0, %c0_i32 : i32, i32
  }
  func.func @transform_1(%arg0: i32, %arg1: i32) -> (i32, i32) {
    %c0_i32 = arith.constant 0 : i32
    %c0_i32_0 = arith.constant 0 : i32
    %c0_i32_1 = arith.constant 0 : i32
    return %c0_i32, %c0_i32_0 : i32, i32
  }
  func.func @transform_2(%arg0: i32, %arg1: i32) -> (i32, i32) {
    %c0_i32 = arith.constant 0 : i32
    %c0_i32_0 = arith.constant 0 : i32
    return %arg0, %c0_i32 : i32, i32
  }
}

</mosaic_0001>

<bundles_post_ra>
// kernel: tpu_custom_call.1
= control target key start
LH: loop header
LB: loop body
LE: loop exit
PB: predicated region body
PF: predicated region fallthrough
CT: control target
= control target key end

     0   :  { %7 = vsyncpa [#allocation5], 0  ;;  %s771_s0 = inlined_call_operand.hbm [shape: f32[32,32], index: 0, kind: input, shape index: {}]   ;;  %s772_s1 = inlined_call_operand.hbm [shape: f32[32,32], index: 1, kind: input, shape index: {}]   ;;  %s773_s2 = inlined_call_operand.vmem [shape: f32[32,1], index: 2, kind: output, shape index: {}]  }
   0x1   :  { %9 = vsyncpa [#allocation5 + $0x1], 0 }
   0x2   :  { %10 = vsyncpa [#allocation7], 0  ;;  %s628_s9 = smov 0   ;;  %s630_s10 = smov 0  }
   0x3   :  { %s632_s11 = smov 0   ;;  %s634_s12 = smov 0  }
   0x4   :  { %s636_s13 = smov 0   ;;  %s638_s14 = smov 0  }
   0x5   :  { %s640_s15 = smov 0   ;;  %s642_s16 = smov 0  }
   0x6 LB: > { %s362_s17 = sadd.s32 4294967295, %s605_s16   ;;  %p364_p0 = scmp.ge.s32.totalorder %s605_s16, 1  ;;  %s605_s16 = sphi %s642_s16, %s16_s16   ;;  %s601_s15 = sphi %s640_s15, %s783_s15   ;;  %s597_s14 = sphi %s638_s14, %s782_s14   ;;  %s593_s13 = sphi %s636_s13, %s781_s13   ;;  %s589_s12 = sphi %s634_s12, %s780_s12   ;;  %s585_s11 = sphi %s632_s11, %s779_s11   ;;  %s581_s10 = sphi %s630_s10, %s778_s10   ;;  %s577_s9 = sphi %s628_s9, %s777_s9  }
   0x7   : > { %p670_p1 = scmp.eq.s32.totalorder %s362_s17, 0  ;;  %p106_p2 = scmp.lt.s32.totalorder %s605_s16, 17 }
   0x8   : > { %s117_s21 = sshll.u32 %s772_s1, 4  ;;  %s607_s23 = smov [#allocation6]   ;;  %s118_s21 = int_to_ptr.hbm [resolvable:$true] %s117_s21 }
   0x9   : > { %p678_p3 = pnand %p364_p0, %p106_p2  ;;  %s119_s24 = sshll.u32 %s607_s23, 4  ;;  %s120_s24 = int_to_ptr.vmem [resolvable:$true] %s119_s24 }
   0xa   : > { %s608_s25 = smov 128   ;;  %s609_s26 = smov 8  }
   0xb   : > { %p387_p4 = pneg %p678_p3  ;;  %s25_s27 = sadd.s32 1, %s597_s14 }
   0xc   : > { %p26_p6 = scmp.ge.s32.totalorder %s25_s27, 4  ;;  %s28_s28 = sadd.s32 1, %s601_s15 }
   0xd   : > { %p388_p5 = pnand %p387_p4, %p670_p1  ;;  %s35_s29 = sadd.s32 1, %s585_s11 }
   0xe   : > { %s785_s27 = smov (%p26_p6, %s25_s27), 0  ;;  %s787_s28 = smov (!%p26_p6, %s28_s28), %s601_s15 }
   0xf   : > { %390 = dma.hbm_to_vmem [thread:$0]  (!%p388_p5), %s118_s21, 512, %s120_s24, [#allocation7], %s608_s25, %s608_s25, %s609_s26  }
  0x10   : > { %p42_p7 = scmp.ne.s32.totalorder %s585_s11, %s581_s10  ;;  %p48_p8 = scmp.ne.s32.totalorder %s581_s10, %s577_s9 }
  0x11   : > { %p30_p9 = scmp.ge.s32.totalorder %s787_s28, 4  ;;  %p43_p10 = scmp.eq.s32.totalorder %s605_s16, 0 }
  0x12   : > { %p699_p11 = por %p670_p1, %p48_p8  ;;  %p396_p12 = scmp.lt.s32.totalorder %s605_s16, 16 }
  0x13   : > { %s789_s28 = smov (%p30_p9, %s787_s28), 0  ;;  %s133_s3 = sand.u32 1, %s585_s11  }
  0x14   : > { %s368_s4 = sshll.u32 %s601_s15, 3  ;;  %s32_s5 = ssub.s32 %s601_s15, %s789_s28 }
  0x15   : > { %p44_p13 = por %p43_p10, %p42_p7  ;;  %p33_p0 = scmp.eq.s32.totalorder %s32_s5, 0 }
  0x16   : > { %s367_s6 = sshll.u32 %s133_s3, 3  ;;  %s141_s9 = scalar_lea.hbm %s771_s0, %s368_s4 }
  0x17   : > { %s714_s17 = scalar_select %p33_p0, %s585_s11, %s35_s29  }
  0x18   : > { %s143_s19 = sshll.u32 %s141_s9, 4  ;;  %s137_s20 = scalar_lea.vmem [#allocation4], %s367_s6  ;;  %s144_s19 = int_to_ptr.hbm [resolvable:$true] %s143_s19 }
  0x19   : > { %s145_s21 = sshll.u32 %s137_s20, 4  ;;  %p392_p2 = pnand %p396_p12, %p44_p13  ;;  %s146_s21 = int_to_ptr.vmem [resolvable:$true] %s145_s21 }
  0x1a   : > { %s134_s23 = scalar_lea.sflag [#allocation5], %s133_s3  ;;  %154 = sbr.rel (%p678_p3) target bundleno = 562 (0x232), region = 28 }
  0x1b   : > { %394 = dma.hbm_to_vmem [thread:$0]  (!%p392_p2), %s144_s19, 128, %s146_s21, %s134_s23  }
  0x1c   : > { %s156_s24 = sand.u32 (!%p678_p3), 1, %s581_s10  }
  0x1d   : > { %s370_s25 = sshll.u32 (!%p678_p3), %s156_s24, 3  ;;  %s157_s26 = scalar_lea.sflag (!%p678_p3), [#allocation5], %s156_s24 }
  0x1e   : > { %s160_s4 = scalar_lea.vmem (!%p678_p3), [#allocation4], %s370_s25 }
  0x1f   : > { %568 = dma.done.wait (%p699_p11), %s157_s26, 128  }
  0x20   : > { %570 = vsyncadd (%p699_p11), %s157_s26, 4294967168 }
  0x21   : > { %572 = dma.done.wait (%p670_p1), [#allocation7], 512  }
  0x22   : > { %574 = vsyncadd (%p670_p1), [#allocation7], 4294966784  ;;  %p186_p3 = scmp.lt.s32.totalorder %s593_s13, 3  ;;  %p373_p4 = scmp.ne.s32.totalorder %s589_s12, 0 }
  0x24   : > { %s187_s22 = scalar_select %p186_p3, %s593_s13, 3 }
  0x25   : > { %193 = sbr.rel (%p373_p4) target bundleno = 45 (0x2d), region = 40 }
  0x26   : > { %s372_s29 = sshll.u32 %s187_s22, 3 }
  0x27   : > { %s734_s6 = scalar_lea.vmem %s773_s2, %s372_s29 }
  0x2a   : > { %vm194_vm0 = vcmask 7168   ;;  %v610_v0 = vmov -1e+30   ;;  %v611_v1 = vmov 0.0  }
  0x2b   : > { %195 = vst.msk [vmem:[#allocation2] sm:$0xff] %vm194_vm0, %v610_v0 }
  0x2c   : > { %196 = vst.msk [vmem:[#allocation3] sm:$0xff] %vm194_vm0, %v611_v1 }
  0x2d PF: > { %s374_s18 = sshll.u32 %s589_s12, 3  ;;  %vm201_vm1 = vcmask 261120   ;;  %v197_v3 = vld [vmem:[%s160_s4] sm:$0xff]  ;;  %s232_s7 = ssub.s32 %s593_s13, %s589_s12  ;;  %v228_v4 = vlaneseq  ;;  %vm239_vm3 = vcmask 64512   ;;  %v612_v12 = vmov 0  }
  0x2e   : > { %s199_s30 = scalar_lea.vmem [#allocation6], %s374_s18  ;;  %s377_s8 = sshll.u32 %s232_s7, 3  ;;  %468 = vset.pattern.permute.xlu0 %v612_v12  ;;  %vm261_vm4 = vcmask 7168  }
  0x2f   : > { %v200_v2 = vld [vmem:[%s199_s30] sm:$0xff]  ;;  %v229_v5 = vshrl.u32 %v228_v4, 7  ;;  %v234_v6 = vstv %s377_s8  ;;  %v231_v7 = vand.u32 127, %v228_v4  ;;  %p378_p1 = scmp.ne.s32.totalorder %s589_s12, 3 }
  0x30   : > { %375 = vmatpush.xpose.msk.msra.mxu0 %vm201_vm1, %v200_v2 }
  0x31   : > { %v235_v8 = vadd.s32 %v234_v6, %v229_v5 }
  0x32   : > { %v238_v13 = vld [vmem:[#allocation2] sm:$0xff] }
  0x33   : > { %376 = vmatmul.msk.f32.vlgmr.msra.gmra.mxu0 %vm201_vm1, %v197_v3  ;;  %vm236_vm2 = vcmp.eq.s32.totalorder %v235_v8, %v231_v7  ;;  %v247_v24 = vld [vmem:[#allocation3] sm:$0xff] }
  0xb0   : > { %v225_v9 = vpop.f32.mrf.mxu0 }
  0xb1   : > { %v237_v10 = vsel %vm236_vm2, -1e+30, %v225_v9 }
  0xb2   : > { %v240_v11 = vsel %vm239_vm3, %v237_v10, -inf }
  0xb3   : > { %241 = vmax.xlane.f32.xlu0 %v240_v11 }
 0x126   : > { %v242_v14 = vpop.xlane.xlu0 %241 }
 0x127   : > { %v243_v15 = vmax.f32 %v238_v13, %v242_v14 }
 0x129   : > { %v244_v16 = vsub.f32 %v238_v13, %v243_v15  ;;  %263 = vst.msk [vmem:[#allocation2] sm:$0xff] %vm261_vm4, %v243_v15  ;;  %251 = vperm.xlu0 %468, %v243_v15  }
 0x12b   : > { %v245_v22 = vmul.f32 1.442695, %v244_v16 }
 0x19b   : > { %v252_v17 = vpop.permute.xlu0 %251 }
 0x19c   : > { %v254_v18 = vsub.f32 %v237_v10, %v252_v17 }
 0x19e   : > { %v255_v19 = vmul.f32 1.442695, %v254_v18 }
 0x1a0   : > { %469 = vpow2.f32 %v255_v19 }
 0x1a1   : > { %471 = vpow2.f32 %v245_v22 }
 0x1a6   : > { %v470_v20 = vpop.eup %469 }
 0x1a7   : > { %v257_v21 = vsel %vm239_vm3, %v470_v20, 0.0  ;;  %v472_v23 = vpop.eup %471 }
 0x1a8   : > { %258 = vadd.xlane.f32.xlu1 %v257_v21  ;;  %v248_v25 = vmul.f32 %v472_v23, %v247_v24 }
 0x21a   : > { %267 = sbr.rel (%p378_p1) target bundleno = 562 (0x232), region = 44 }
 0x21b   : > { %v259_v26 = vpop.xlane.xlu1 %258 }
 0x21c   : > { %v260_v27 = vadd.f32 %v259_v26, %v248_v25 }
 0x21e   : > { %262 = vst.msk [vmem:[#allocation3] sm:$0xff] %vm261_vm4, %v260_v27 }
 0x21f   : > { %v268_v30 = vld [vmem:[#allocation2] sm:$0xff] }
 0x225   : > { %v269_v28 = vld [vmem:[#allocation3] sm:$0xff] }
 0x226   : > { %473 = vlog2.f32 %v269_v28 }
 0x22c   : > { %v474_v29 = vpop.eup %473 }
 0x22d   : > { %v271_v31 = vmul.f32 0.6931472, %v474_v29 }
 0x22f   : > { %v272_v32 = vadd.f32 %v271_v31, %v268_v30 }
 0x231   : > { %273 = vst.msk [vmem:[%s734_s6] sm:$0xff] %vm261_vm4, %v272_v32 }
 0x232 PF: > { %s16_s16 = sadd.s32 1, %s605_s16   ;;  %s777_s9 = smov %s581_s10 }
 0x233   : > { %p13_p5 = scmp.ge.s32.totalorder %s16_s16, 18   ;;  %s778_s10 = smov %s585_s11 }
 0x234   : > { %s779_s11 = smov %s714_s17  ;;  %s780_s12 = smov %s597_s14 }
 0x235   : > { %s781_s13 = smov %s601_s15  ;;  %s782_s14 = smov %s785_s27 }
 0x236   : > { %s783_s15 = smov %s789_s28  ;;  %15 = sbr.rel (!%p13_p5) target bundleno = 6 (0x6), region = 81 }
 0x23b   :  { %293 = vsyncpa [#allocation5], 1 }
 0x23c   :  { %295 = vsyncpa [#allocation5 + $0x1], 1 }
 0x23d   :  { %296 = vsyncpa [#allocation7], 1 }

</bundles_post_ra>
